<compile_context>
chip_gen: v7x
topology: tpu7x:2x2x1
jax: 0.10.0
libtpu: 0.0.40
codegen_flags: <defaults>
</compile_context>

<pallas_src>
import functools

import numpy as np
import jax
import jax.numpy as jnp
from jax.experimental import pallas as pl
from jax.experimental.pallas import tpu as pltpu  # noqa: F401  (TPU backend assumed)

LRELU_SLOPE = 0.2   # nn.LeakyReLU(0.2)
BN_EPS = 0.8        # nn.BatchNorm1d(out_feat, 0.8) -> second positional arg is eps


def _generator_kernel(*refs, layer_kinds):
    """Fused MLP generator forward.

    refs = (noise_ref, <per-layer params...>, out_ref)
    layer_kinds: static tuple of (activation, has_bn) per layer.  Per-layer params are
      w (bf16, (in,out)), b (f32, (1,out)) [+ gamma, beta (f32, (1,out)) if has_bn].
    """
    noise_ref = refs[0]
    out_ref = refs[-1]
    params = refs[1:-1]

    h = noise_ref[...].astype(jnp.float32)
    idx = 0
    for act, has_bn in layer_kinds:
        w = params[idx][...]                     # bf16 (in, out), pre-transposed
        b = params[idx + 1][...]                 # f32  (1, out)
        idx += 2
        # MXU matmul: bf16 operands, f32 accumulate; epilogue stays in f32.
        h = jnp.dot(h.astype(jnp.bfloat16), w,
                    preferred_element_type=jnp.float32) + b
        if has_bn:
            gamma = params[idx][...]
            beta = params[idx + 1][...]
            idx += 2
            # BatchNorm1d, training-mode (module default): biased batch statistics.
            mean = jnp.mean(h, axis=0, keepdims=True)
            var = jnp.mean(jnp.square(h - mean), axis=0, keepdims=True)
            h = (h - mean) * jax.lax.rsqrt(var + BN_EPS) * gamma + beta
        if act == "lrelu":
            h = jnp.where(h > 0.0, h, LRELU_SLOPE * h)
        else:  # "tanh"
            h = jnp.tanh(h)
    out_ref[...] = h.astype(out_ref.dtype)


def calculate_linear_layers(end_dim):
    """Mirror of the module's layer-count rule (doubling from 128)."""
    n_layers = -1
    last_dim = 128
    not_close = True
    while not_close:
        last_dim = last_dim * 2
        n_layers += 1
        if end_dim - last_dim < 0:
            not_close = False
    return n_layers


def init_params(key, *, latent_dim, img_shape, num_classes, conditioned):
    """Deterministic params matching the module's layer structure.

    Linear weights use PyTorch's default U(-1/sqrt(in), 1/sqrt(in)) init, stored
    pre-transposed to (in, out) and pre-cast to bf16; biases f32 (1, out);
    BatchNorm gamma=1, beta=0.
    """
    out_dim = int(np.prod(img_shape))
    n_layers = calculate_linear_layers(out_dim)
    start_dim = latent_dim + num_classes if conditioned else latent_dim

    # (in, out, has_bn, activation) per layer, mirroring the nn.Sequential.
    layer_dims = [(start_dim, 128, False, "lrelu")]
    last = 128
    for _ in range(n_layers):
        layer_dims.append((last, last * 2, True, "lrelu"))
        last *= 2
    layer_dims.append((last, out_dim, False, "tanh"))

    flat = []
    layer_kinds = []
    keys = jax.random.split(key, len(layer_dims) + 1)
    for (d_in, d_out, has_bn, act), k in zip(layer_dims, keys[:-1]):
        kw, kb = jax.random.split(k)
        bound = 1.0 / float(np.sqrt(d_in))
        w = jax.random.uniform(kw, (d_in, d_out), jnp.float32, -bound, bound)
        b = jax.random.uniform(kb, (1, d_out), jnp.float32, -bound, bound)
        flat += [w.astype(jnp.bfloat16), b]
        if has_bn:
            flat += [jnp.ones((1, d_out), jnp.float32),    # gamma
                     jnp.zeros((1, d_out), jnp.float32)]   # beta
        layer_kinds.append((act, has_bn))

    label_emb = jax.random.normal(keys[-1], (num_classes, num_classes), jnp.float32)
    return {
        "flat": flat,
        "layer_kinds": tuple(layer_kinds),
        "img_shape": tuple(img_shape),
        "conditioned": bool(conditioned),
        "label_emb": label_emb,
    }


def generator_forward(noise, labels, params):
    """forward(noise, labels) -> img of shape (B, *img_shape)."""
    if params["conditioned"]:
        # nn.Embedding lookup + concat is plain-JAX glue outside the kernel.
        emb = jnp.take(params["label_emb"], labels, axis=0)
        gen_input = jnp.concatenate([emb, noise], axis=-1)
    else:
        gen_input = noise

    img_shape = params["img_shape"]
    out_dim = int(np.prod(img_shape))
    B = gen_input.shape[0]
    args = (gen_input,) + tuple(params["flat"])

    out = pl.pallas_call(
        functools.partial(_generator_kernel, layer_kinds=params["layer_kinds"]),
        out_shape=jax.ShapeDtypeStruct((B, out_dim), jnp.float32),
        in_specs=[pl.BlockSpec(a.shape, lambda: (0, 0)) for a in args],
        out_specs=pl.BlockSpec((B, out_dim), lambda: (0, 0)),
    )(*args)
    return out.reshape((B,) + tuple(img_shape))


def generator_forward_ref(noise, labels, params):
    """Pure-JAX f32 reference (same math, no bf16 activation casts)."""
    if params["conditioned"]:
        x = jnp.concatenate([jnp.take(params["label_emb"], labels, axis=0), noise], -1)
    else:
        x = noise
    flat = params["flat"]
    h = x.astype(jnp.float32)
    idx = 0
    for act, has_bn in params["layer_kinds"]:
        w = flat[idx].astype(jnp.float32)
        b = flat[idx + 1]
        idx += 2
        h = h @ w + b
        if has_bn:
            g, be = flat[idx], flat[idx + 1]
            idx += 2
            mean = jnp.mean(h, axis=0, keepdims=True)
            var = jnp.mean(jnp.square(h - mean), axis=0, keepdims=True)
            h = (h - mean) * jax.lax.rsqrt(var + BN_EPS) * g + be
        h = jnp.where(h > 0.0, h, LRELU_SLOPE * h) if act == "lrelu" else jnp.tanh(h)
    return h.reshape((h.shape[0],) + params["img_shape"])


if __name__ == "__main__":
    key = jax.random.PRNGKey(0)
    k_noise, k_params = jax.random.split(key)

    img_shape = (2, 16, 16)   # prod = 512 -> n_layers = 2: 128 -> 256 -> 512 -> 512
    latent_dim = 64
    num_classes = 10
    batch = 8

    params = init_params(k_params, latent_dim=latent_dim, img_shape=img_shape,
                         num_classes=num_classes, conditioned=False)
    noise = jax.random.normal(k_noise, (batch, latent_dim), jnp.float32)

    fwd = jax.jit(lambda n: generator_forward(n, None, params))
    img = fwd(noise)
    jax.block_until_ready(img)

    assert img.shape == (batch,) + img_shape, img.shape
    assert bool(jnp.all(jnp.isfinite(img)))
    assert bool(jnp.all(jnp.abs(img) <= 1.0))  # tanh range

    ref = generator_forward_ref(noise, None, params)
    max_err = float(jnp.max(jnp.abs(img - ref)))
    assert max_err < 1e-1, f"max abs err vs f32 reference: {max_err}"

    print("KERNEL_OK")
</pallas_src>

<mosaic_0001>
module attributes {stable_mosaic.version = 11 : i64} {
  func.func @_generator_kernel(%arg0: memref<8x64xf32, #tpu.memory_space<vmem>>, %arg1: memref<64x128xbf16, #tpu.memory_space<vmem>>, %arg2: memref<1x128xf32, #tpu.memory_space<vmem>>, %arg3: memref<128x256xbf16, #tpu.memory_space<vmem>>, %arg4: memref<1x256xf32, #tpu.memory_space<vmem>>, %arg5: memref<1x256xf32, #tpu.memory_space<vmem>>, %arg6: memref<1x256xf32, #tpu.memory_space<vmem>>, %arg7: memref<256x512xbf16, #tpu.memory_space<vmem>>, %arg8: memref<1x512xf32, #tpu.memory_space<vmem>>, %arg9: memref<1x512xf32, #tpu.memory_space<vmem>>, %arg10: memref<1x512xf32, #tpu.memory_space<vmem>>, %arg11: memref<512x512xbf16, #tpu.memory_space<vmem>>, %arg12: memref<1x512xf32, #tpu.memory_space<vmem>>, %arg13: memref<8x512xf32, #tpu.memory_space<vmem>>) attributes {dimension_semantics = [], scalar_prefetch = 0 : i64, scratch_operands = 0 : i64, tpu.core_type = #tpu.core_type<tc>} {
    %c0 = arith.constant 0 : index
    %c0_0 = arith.constant 0 : index
    %0 = vector.load %arg0[%c0, %c0_0] : memref<8x64xf32, #tpu.memory_space<vmem>>, vector<8x64xf32>
    %c0_1 = arith.constant 0 : index
    %c0_2 = arith.constant 0 : index
    %1 = vector.load %arg1[%c0_1, %c0_2] : memref<64x128xbf16, #tpu.memory_space<vmem>>, vector<64x128xbf16>
    %c0_3 = arith.constant 0 : index
    %c0_4 = arith.constant 0 : index
    %2 = vector.load %arg2[%c0_3, %c0_4] : memref<1x128xf32, #tpu.memory_space<vmem>>, vector<1x128xf32>
    %3 = arith.truncf %0 : vector<8x64xf32> to vector<8x64xbf16>
    %cst = arith.constant dense<0.000000e+00> : vector<8x128xf32>
    %4 = tpu.matmul %3, %1, %cst {dimension_numbers = #tpu.dot_dimension_numbers<[1], [0], [0], [1], [0, 0, 1, 1], [], []>} : vector<8x64xbf16>, vector<64x128xbf16>, vector<8x128xf32> -> vector<8x128xf32>
    %5 = vector.broadcast %2 : vector<1x128xf32> to vector<8x128xf32>
    %6 = arith.addf %4, %5 : vector<8x128xf32>
    %cst_5 = arith.constant 0.000000e+00 : f32
    %7 = vector.broadcast %cst_5 : f32 to vector<8x128xf32>
    %8 = arith.cmpf ogt, %6, %7 : vector<8x128xf32>
    %cst_6 = arith.constant 2.000000e-01 : f32
    %9 = vector.broadcast %cst_6 : f32 to vector<8x128xf32>
    %10 = arith.mulf %9, %6 : vector<8x128xf32>
    %11 = arith.select %8, %6, %10 : vector<8x128xi1>, vector<8x128xf32>
    %c0_7 = arith.constant 0 : index
    %c0_8 = arith.constant 0 : index
    %12 = vector.load %arg3[%c0_7, %c0_8] : memref<128x256xbf16, #tpu.memory_space<vmem>>, vector<128x256xbf16>
    %c0_9 = arith.constant 0 : index
    %c0_10 = arith.constant 0 : index
    %13 = vector.load %arg4[%c0_9, %c0_10] : memref<1x256xf32, #tpu.memory_space<vmem>>, vector<1x256xf32>
    %14 = arith.truncf %11 : vector<8x128xf32> to vector<8x128xbf16>
    %cst_11 = arith.constant dense<0.000000e+00> : vector<8x256xf32>
    %15 = tpu.matmul %14, %12, %cst_11 {dimension_numbers = #tpu.dot_dimension_numbers<[1], [0], [0], [1], [0, 0, 1, 1], [], []>} : vector<8x128xbf16>, vector<128x256xbf16>, vector<8x256xf32> -> vector<8x256xf32>
    %16 = vector.broadcast %13 : vector<1x256xf32> to vector<8x256xf32>
    %17 = arith.addf %15, %16 : vector<8x256xf32>
    %c0_12 = arith.constant 0 : index
    %c0_13 = arith.constant 0 : index
    %18 = vector.load %arg5[%c0_12, %c0_13] : memref<1x256xf32, #tpu.memory_space<vmem>>, vector<1x256xf32>
    %c0_14 = arith.constant 0 : index
    %c0_15 = arith.constant 0 : index
    %19 = vector.load %arg6[%c0_14, %c0_15] : memref<1x256xf32, #tpu.memory_space<vmem>>, vector<1x256xf32>
    %cst_16 = arith.constant dense<0.000000e+00> : vector<256xf32>
    %20 = vector.multi_reduction <add>, %17, %cst_16 [0] : vector<8x256xf32> to vector<256xf32>
    %21 = vector.shape_cast %20 : vector<256xf32> to vector<1x256xf32>
    %cst_17 = arith.constant 8.000000e+00 : f32
    %22 = vector.broadcast %cst_17 : f32 to vector<1x256xf32>
    %23 = arith.divf %21, %22 : vector<1x256xf32>
    %24 = vector.broadcast %23 : vector<1x256xf32> to vector<8x256xf32>
    %25 = arith.subf %17, %24 : vector<8x256xf32>
    %26 = arith.mulf %25, %25 : vector<8x256xf32>
    %cst_18 = arith.constant dense<0.000000e+00> : vector<256xf32>
    %27 = vector.multi_reduction <add>, %26, %cst_18 [0] : vector<8x256xf32> to vector<256xf32>
    %28 = vector.shape_cast %27 : vector<256xf32> to vector<1x256xf32>
    %cst_19 = arith.constant 8.000000e+00 : f32
    %29 = vector.broadcast %cst_19 : f32 to vector<1x256xf32>
    %30 = arith.divf %28, %29 : vector<1x256xf32>
    %31 = vector.broadcast %23 : vector<1x256xf32> to vector<8x256xf32>
    %32 = arith.subf %17, %31 : vector<8x256xf32>
    %cst_20 = arith.constant 8.000000e-01 : f32
    %33 = vector.broadcast %cst_20 : f32 to vector<1x256xf32>
    %34 = arith.addf %30, %33 : vector<1x256xf32>
    %35 = math.rsqrt %34 : vector<1x256xf32>
    %36 = vector.broadcast %35 : vector<1x256xf32> to vector<8x256xf32>
    %37 = arith.mulf %32, %36 : vector<8x256xf32>
    %38 = vector.broadcast %18 : vector<1x256xf32> to vector<8x256xf32>
    %39 = arith.mulf %37, %38 : vector<8x256xf32>
    %40 = vector.broadcast %19 : vector<1x256xf32> to vector<8x256xf32>
    %41 = arith.addf %39, %40 : vector<8x256xf32>
    %cst_21 = arith.constant 0.000000e+00 : f32
    %42 = vector.broadcast %cst_21 : f32 to vector<8x256xf32>
    %43 = arith.cmpf ogt, %41, %42 : vector<8x256xf32>
    %cst_22 = arith.constant 2.000000e-01 : f32
    %44 = vector.broadcast %cst_22 : f32 to vector<8x256xf32>
    %45 = arith.mulf %44, %41 : vector<8x256xf32>
    %46 = arith.select %43, %41, %45 : vector<8x256xi1>, vector<8x256xf32>
    %c0_23 = arith.constant 0 : index
    %c0_24 = arith.constant 0 : index
    %47 = vector.load %arg7[%c0_23, %c0_24] : memref<256x512xbf16, #tpu.memory_space<vmem>>, vector<256x512xbf16>
    %c0_25 = arith.constant 0 : index
    %c0_26 = arith.constant 0 : index
    %48 = vector.load %arg8[%c0_25, %c0_26] : memref<1x512xf32, #tpu.memory_space<vmem>>, vector<1x512xf32>
    %49 = arith.truncf %46 : vector<8x256xf32> to vector<8x256xbf16>
    %cst_27 = arith.constant dense<0.000000e+00> : vector<8x512xf32>
    %50 = tpu.matmul %49, %47, %cst_27 {dimension_numbers = #tpu.dot_dimension_numbers<[1], [0], [0], [1], [0, 0, 1, 1], [], []>} : vector<8x256xbf16>, vector<256x512xbf16>, vector<8x512xf32> -> vector<8x512xf32>
    %51 = vector.broadcast %48 : vector<1x512xf32> to vector<8x512xf32>
    %52 = arith.addf %50, %51 : vector<8x512xf32>
    %c0_28 = arith.constant 0 : index
    %c0_29 = arith.constant 0 : index
    %53 = vector.load %arg9[%c0_28, %c0_29] : memref<1x512xf32, #tpu.memory_space<vmem>>, vector<1x512xf32>
    %c0_30 = arith.constant 0 : index
    %c0_31 = arith.constant 0 : index
    %54 = vector.load %arg10[%c0_30, %c0_31] : memref<1x512xf32, #tpu.memory_space<vmem>>, vector<1x512xf32>
    %cst_32 = arith.constant dense<0.000000e+00> : vector<512xf32>
    %55 = vector.multi_reduction <add>, %52, %cst_32 [0] : vector<8x512xf32> to vector<512xf32>
    %56 = vector.shape_cast %55 : vector<512xf32> to vector<1x512xf32>
    %cst_33 = arith.constant 8.000000e+00 : f32
    %57 = vector.broadcast %cst_33 : f32 to vector<1x512xf32>
    %58 = arith.divf %56, %57 : vector<1x512xf32>
    %59 = vector.broadcast %58 : vector<1x512xf32> to vector<8x512xf32>
    %60 = arith.subf %52, %59 : vector<8x512xf32>
    %61 = arith.mulf %60, %60 : vector<8x512xf32>
    %cst_34 = arith.constant dense<0.000000e+00> : vector<512xf32>
    %62 = vector.multi_reduction <add>, %61, %cst_34 [0] : vector<8x512xf32> to vector<512xf32>
    %63 = vector.shape_cast %62 : vector<512xf32> to vector<1x512xf32>
    %cst_35 = arith.constant 8.000000e+00 : f32
    %64 = vector.broadcast %cst_35 : f32 to vector<1x512xf32>
    %65 = arith.divf %63, %64 : vector<1x512xf32>
    %66 = vector.broadcast %58 : vector<1x512xf32> to vector<8x512xf32>
    %67 = arith.subf %52, %66 : vector<8x512xf32>
    %cst_36 = arith.constant 8.000000e-01 : f32
    %68 = vector.broadcast %cst_36 : f32 to vector<1x512xf32>
    %69 = arith.addf %65, %68 : vector<1x512xf32>
    %70 = math.rsqrt %69 : vector<1x512xf32>
    %71 = vector.broadcast %70 : vector<1x512xf32> to vector<8x512xf32>
    %72 = arith.mulf %67, %71 : vector<8x512xf32>
    %73 = vector.broadcast %53 : vector<1x512xf32> to vector<8x512xf32>
    %74 = arith.mulf %72, %73 : vector<8x512xf32>
    %75 = vector.broadcast %54 : vector<1x512xf32> to vector<8x512xf32>
    %76 = arith.addf %74, %75 : vector<8x512xf32>
    %cst_37 = arith.constant 0.000000e+00 : f32
    %77 = vector.broadcast %cst_37 : f32 to vector<8x512xf32>
    %78 = arith.cmpf ogt, %76, %77 : vector<8x512xf32>
    %cst_38 = arith.constant 2.000000e-01 : f32
    %79 = vector.broadcast %cst_38 : f32 to vector<8x512xf32>
    %80 = arith.mulf %79, %76 : vector<8x512xf32>
    %81 = arith.select %78, %76, %80 : vector<8x512xi1>, vector<8x512xf32>
    %c0_39 = arith.constant 0 : index
    %c0_40 = arith.constant 0 : index
    %82 = vector.load %arg11[%c0_39, %c0_40] : memref<512x512xbf16, #tpu.memory_space<vmem>>, vector<512x512xbf16>
    %c0_41 = arith.constant 0 : index
    %c0_42 = arith.constant 0 : index
    %83 = vector.load %arg12[%c0_41, %c0_42] : memref<1x512xf32, #tpu.memory_space<vmem>>, vector<1x512xf32>
    %84 = arith.truncf %81 : vector<8x512xf32> to vector<8x512xbf16>
    %cst_43 = arith.constant dense<0.000000e+00> : vector<8x512xf32>
    %85 = tpu.matmul %84, %82, %cst_43 {dimension_numbers = #tpu.dot_dimension_numbers<[1], [0], [0], [1], [0, 0, 1, 1], [], []>} : vector<8x512xbf16>, vector<512x512xbf16>, vector<8x512xf32> -> vector<8x512xf32>
    %86 = vector.broadcast %83 : vector<1x512xf32> to vector<8x512xf32>
    %87 = arith.addf %85, %86 : vector<8x512xf32>
    %88 = math.tanh %87 : vector<8x512xf32>
    %c0_44 = arith.constant 0 : index
    %c0_45 = arith.constant 0 : index
    %89 = vector.load %arg13[%c0_44, %c0_45] : memref<8x512xf32, #tpu.memory_space<vmem>>, vector<8x512xf32>
    tpu.vector_store %arg13[%c0_44, %c0_45], %88 {strides = array<i32>} : memref<8x512xf32, #tpu.memory_space<vmem>>, vector<8x512xf32>,
    return
  }
}

</mosaic_0001>

<bundles_post_ra>
// kernel: _lambda_.1
= control target key start
LH: loop header
LB: loop body
LE: loop exit
PB: predicated region body
PF: predicated region fallthrough
CT: control target
= control target key end

     0   :  { %v2538_v0 = vmov 0.0   ;;  %vm2539_vm0 = vmmov 0   ;;  %vm86_vm1 = vcmask 523264   ;;  %v2540_v23 = vmov 0   ;;  %s3327_s1 = inlined_call_operand.vmem [shape: bf16[64,128], index: 1, kind: input, shape index: {}]   ;;  %s3328_s3 = inlined_call_operand.vmem [shape: bf16[128,256], index: 3, kind: input, shape index: {}]   ;;  %s3329_s0 = inlined_call_operand.vmem [shape: f32[8,64], index: 0, kind: input, shape index: {}]   ;;  %s3330_s7 = inlined_call_operand.vmem [shape: bf16[256,512], index: 7, kind: input, shape index: {}]   ;;  %s3331_s2 = inlined_call_operand.vmem [shape: f32[1,128], index: 2, kind: input, shape index: {}]   ;;  %s3332_s11 = inlined_call_operand.vmem [shape: bf16[512,512], index: 11, kind: input, shape index: {}]   ;;  %s3333_s4 = inlined_call_operand.vmem [shape: f32[1,256], index: 4, kind: input, shape index: {}]   ;;  %s3334_s5 = inlined_call_operand.vmem [shape: f32[1,256], index: 5, kind: input, shape index: {}]   ;;  %s3335_s6 = inlined_call_operand.vmem [shape: f32[1,256], index: 6, kind: input, shape index: {}]   ;;  %s3336_s8 = inlined_call_operand.vmem [shape: f32[1,512], index: 8, kind: input, shape index: {}]   ;;  %s3337_s9 = inlined_call_operand.vmem [shape: f32[1,512], index: 9, kind: input, shape index: {}]   ;;  %s3338_s10 = inlined_call_operand.vmem [shape: f32[1,512], index: 10, kind: input, shape index: {}]   ;;  %s3339_s12 = inlined_call_operand.vmem [shape: f32[1,512], index: 12, kind: input, shape index: {}]   ;;  %s3340_s13 = inlined_call_operand.vmem [shape: f32[8,512], index: 13, kind: output, shape index: {}]  }
   0x1   :  { %2175 = vmatprep.subr.bf16.mxu0 %v2538_v0  ;;  %v2202_v1 = vld [vmem:[%s3327_s1] sm:$0xff]   ;;  %2183 = vmatprep.mubr.msk.bf16.mxu0 %vm2539_vm0, %v2538_v0  ;;  %v2203_v2 = vld [vmem:[%s3327_s1 + $0x8] sm:$0xff]   ;;  %v2204_v5 = vld [vmem:[%s3327_s1 + $0x10] sm:$0xff]  }
   0x2   :  { %2176 = vmatpush3.bf16.msra.mxu0 %v2202_v1  ;;  %v2206_v3 = vld [vmem:[%s3328_s3 + $0x4] ss:$8 sps:$4 sm:$0xff]   ;;  %v2208_v4 = vld [vmem:[%s3328_s3] ss:$8 sps:$4 sm:$0xff]   ;;  %v2209_v6 = vld [vmem:[%s3328_s3 + $0x14] ss:$8 sps:$4 sm:$0xff]   ;;  %274 = vmatprep.mubr.bf16.mxu1 %v2540_v23 }
   0x3   :  { %2177 = vmatprep.subr.bf16.mxu0 %v2538_v0  ;;  %242 = vmatprep.subr.bf16.mxu1 %v2206_v3  ;;  %v2211_v7 = vld [vmem:[%s3328_s3 + $0x10] ss:$8 sps:$4 sm:$0xff]   ;;  %v2212_v8 = vld [vmem:[%s3328_s3 + $0x24] ss:$8 sps:$4 sm:$0xff]   ;;  %v2214_v11 = vld [vmem:[%s3328_s3 + $0x20] ss:$8 sps:$4 sm:$0xff]  }
   0x4   :  { %243 = vmatpush1.bf16.msra.mxu1 %v2208_v4  ;;  %v2205_v9 = vld [vmem:[%s3327_s1 + $0x18] sm:$0xff]   ;;  %v45_v10 = vld [vmem:[%s3329_s0] sm:$0xff] }
   0x5   :  { %244 = vmatprep.subr.bf16.mxu1 %v2209_v6  ;;  %v2215_v12 = vld [vmem:[%s3328_s3 + $0x34] ss:$8 sps:$4 sm:$0xff]   ;;  %v55_v13 = vpack.c.bf16 %v45_v10, %v45_v10  ;;  %v2217_v14 = vld [vmem:[%s3328_s3 + $0x30] ss:$8 sps:$4 sm:$0xff]   ;;  %v2218_v15 = vld [vmem:[%s3328_s3 + $0x44] ss:$8 sps:$4 sm:$0xff]  }
   0x6   :  { %2178 = vmatpush3.bf16.msra.mxu0 %v2203_v2  ;;  %v2220_v16 = vld [vmem:[%s3328_s3 + $0x40] ss:$8 sps:$4 sm:$0xff]   ;;  %v2221_v17 = vld [vmem:[%s3328_s3 + $0x54] ss:$8 sps:$4 sm:$0xff]   ;;  %v2223_v18 = vld [vmem:[%s3328_s3 + $0x50] ss:$8 sps:$4 sm:$0xff]  }
   0x7   :  { %2179 = vmatprep.subr.bf16.mxu0 %v2538_v0  ;;  %v2224_v19 = vld [vmem:[%s3328_s3 + $0x64] ss:$8 sps:$4 sm:$0xff]   ;;  %v2226_v20 = vld [vmem:[%s3328_s3 + $0x60] ss:$8 sps:$4 sm:$0xff]   ;;  %v2227_v21 = vld [vmem:[%s3328_s3 + $0x74] ss:$8 sps:$4 sm:$0xff]  }
   0x8   :  { %245 = vmatpush1.bf16.msra.mxu1 %v2211_v7  ;;  %v2229_v22 = vld [vmem:[%s3328_s3 + $0x70] ss:$8 sps:$4 sm:$0xff]   ;;  %v2232_v25 = vld [vmem:[%s3330_s7 + $0x4] ss:$16 sps:$4 sm:$0xff]   ;;  %v2235_v26 = vld [vmem:[%s3330_s7 + $0xc] ss:$16 sps:$4 sm:$0xff]  }
   0x9   :  { %246 = vmatprep.subr.bf16.mxu1 %v2212_v8  ;;  %v2230_v24 = vld [vmem:[%s3330_s7] ss:$16 sps:$4 sm:$0xff]   ;;  %v2233_v35 = vld [vmem:[%s3330_s7 + $0x8] ss:$16 sps:$4 sm:$0xff]   ;;  %v2238_v37 = vld [vmem:[%s3330_s7 + $0x24] ss:$16 sps:$4 sm:$0xff]  }
   0xa   :  { %2180 = vmatpush3.bf16.msra.mxu0 %v2204_v5  ;;  %v1956_v27 = vld [vmem:[%s3331_s2] ss:$0 sm:$0xff]  ;;  %v2241_v38 = vld [vmem:[%s3330_s7 + $0x2c] ss:$16 sps:$4 sm:$0xff]   ;;  %v2239_v40 = vld [vmem:[%s3330_s7 + $0x28] ss:$16 sps:$4 sm:$0xff]  }
   0xb   :  { %2181 = vmatprep.subr.bf16.mxu0 %v2538_v0  ;;  %v2236_v39 = vld [vmem:[%s3330_s7 + $0x20] ss:$16 sps:$4 sm:$0xff]   ;;  %v2244_v41 = vld [vmem:[%s3330_s7 + $0x44] ss:$16 sps:$4 sm:$0xff]   ;;  %v2247_v42 = vld [vmem:[%s3330_s7 + $0x4c] ss:$16 sps:$4 sm:$0xff]  }
   0xc   :  { %247 = vmatpush1.bf16.msra.mxu1 %v2214_v11  ;;  %v2242_v43 = vld [vmem:[%s3330_s7 + $0x40] ss:$16 sps:$4 sm:$0xff]   ;;  %v2245_v44 = vld [vmem:[%s3330_s7 + $0x48] ss:$16 sps:$4 sm:$0xff]   ;;  %v2250_v45 = vld [vmem:[%s3330_s7 + $0x64] ss:$16 sps:$4 sm:$0xff]  }
   0xd   :  { %248 = vmatprep.subr.bf16.mxu1 %v2215_v12  ;;  %v2253_v46 = vld [vmem:[%s3330_s7 + $0x6c] ss:$16 sps:$4 sm:$0xff]   ;;  %v2248_v47 = vld [vmem:[%s3330_s7 + $0x60] ss:$16 sps:$4 sm:$0xff]   ;;  %v2251_v48 = vld [vmem:[%s3330_s7 + $0x68] ss:$16 sps:$4 sm:$0xff]  }
   0xe   :  { %2182 = vmatpush3.bf16.msra.mxu0 %v2205_v9  ;;  %v2256_v49 = vld [vmem:[%s3330_s7 + $0x84] ss:$16 sps:$4 sm:$0xff]   ;;  %v2259_v50 = vld [vmem:[%s3330_s7 + $0x8c] ss:$16 sps:$4 sm:$0xff]   ;;  %v2254_v51 = vld [vmem:[%s3330_s7 + $0x80] ss:$16 sps:$4 sm:$0xff]  }
   0xf   :  { %764 = vmatprep.subr.bf16.mxu0 %v2232_v25  ;;  %v2257_v52 = vld [vmem:[%s3330_s7 + $0x88] ss:$16 sps:$4 sm:$0xff]   ;;  %v2262_v53 = vld [vmem:[%s3330_s7 + $0xa4] ss:$16 sps:$4 sm:$0xff]   ;;  %v2265_v54 = vld [vmem:[%s3330_s7 + $0xac] ss:$16 sps:$4 sm:$0xff]  }
  0x10   :  { %249 = vmatpush1.bf16.msra.mxu1 %v2217_v14  ;;  %v2260_v55 = vld [vmem:[%s3330_s7 + $0xa0] ss:$16 sps:$4 sm:$0xff]   ;;  %v2263_v56 = vld [vmem:[%s3330_s7 + $0xa8] ss:$16 sps:$4 sm:$0xff]   ;;  %v2268_v57 = vld [vmem:[%s3330_s7 + $0xc4] ss:$16 sps:$4 sm:$0xff]  }
  0x11   :  { %2184 = vmatmul.mubr.msk.bf16.vlgmr.msra.gmra.mrb[0].mxu0 %vm86_vm1, %v55_v13  ;;  %250 = vmatprep.subr.bf16.mxu1 %v2218_v15  ;;  %v2271_v58 = vld [vmem:[%s3330_s7 + $0xcc] ss:$16 sps:$4 sm:$0xff]   ;;  %v2266_v59 = vld [vmem:[%s3330_s7 + $0xc0] ss:$16 sps:$4 sm:$0xff]   ;;  %v2269_v60 = vld [vmem:[%s3330_s7 + $0xc8] ss:$16 sps:$4 sm:$0xff]  }
  0x12   :  { %765 = vmatpush1.bf16.msra.mxu0 %v2230_v24  ;;  %v2274_v61 = vld [vmem:[%s3330_s7 + $0xe4] ss:$16 sps:$4 sm:$0xff]   ;;  %v2277_v62 = vld [vmem:[%s3330_s7 + $0xec] ss:$16 sps:$4 sm:$0xff]   ;;  %v2272_v63 = vld [vmem:[%s3330_s7 + $0xe0] ss:$16 sps:$4 sm:$0xff]  }
  0x13   :  { %766 = vmatprep.subr.bf16.mxu0 %v2238_v37  ;;  %v2275_v0 = vld [vmem:[%s3330_s7 + $0xe8] ss:$16 sps:$4 sm:$0xff]   ;;  %v2280_v1 = vld [vmem:[%s3330_s7 + $0x104] ss:$16 sps:$4 sm:$0xff]   ;;  %v2283_v2 = vld [vmem:[%s3330_s7 + $0x10c] ss:$16 sps:$4 sm:$0xff]  }
  0x14   :  { %251 = vmatpush1.bf16.msra.mxu1 %v2220_v16  ;;  %v2278_v3 = vld [vmem:[%s3330_s7 + $0x100] ss:$16 sps:$4 sm:$0xff]   ;;  %v2281_v4 = vld [vmem:[%s3330_s7 + $0x108] ss:$16 sps:$4 sm:$0xff]   ;;  %v2286_v5 = vld [vmem:[%s3330_s7 + $0x124] ss:$16 sps:$4 sm:$0xff]  }
  0x15   :  { %252 = vmatprep.subr.bf16.mxu1 %v2221_v17  ;;  %v2289_v6 = vld [vmem:[%s3330_s7 + $0x12c] ss:$16 sps:$4 sm:$0xff]   ;;  %v2284_v7 = vld [vmem:[%s3330_s7 + $0x120] ss:$16 sps:$4 sm:$0xff]   ;;  %v2287_v8 = vld [vmem:[%s3330_s7 + $0x128] ss:$16 sps:$4 sm:$0xff]  }
  0x16   :  { %767 = vmatpush1.bf16.msra.mxu0 %v2236_v39  ;;  %v2292_v9 = vld [vmem:[%s3330_s7 + $0x144] ss:$16 sps:$4 sm:$0xff]   ;;  %v2295_v10 = vld [vmem:[%s3330_s7 + $0x14c] ss:$16 sps:$4 sm:$0xff]   ;;  %v2290_v11 = vld [vmem:[%s3330_s7 + $0x140] ss:$16 sps:$4 sm:$0xff]  }
  0x17   :  { %768 = vmatprep.subr.bf16.mxu0 %v2244_v41  ;;  %v2293_v12 = vld [vmem:[%s3330_s7 + $0x148] ss:$16 sps:$4 sm:$0xff]   ;;  %v2298_v13 = vld [vmem:[%s3330_s7 + $0x164] ss:$16 sps:$4 sm:$0xff]   ;;  %v2301_v14 = vld [vmem:[%s3330_s7 + $0x16c] ss:$16 sps:$4 sm:$0xff]  }
  0x18   :  { %253 = vmatpush1.bf16.msra.mxu1 %v2223_v18  ;;  %v2296_v15 = vld [vmem:[%s3330_s7 + $0x160] ss:$16 sps:$4 sm:$0xff]   ;;  %v2299_v16 = vld [vmem:[%s3330_s7 + $0x168] ss:$16 sps:$4 sm:$0xff]   ;;  %v2304_v17 = vld [vmem:[%s3330_s7 + $0x184] ss:$16 sps:$4 sm:$0xff]  }
  0x19   :  { %254 = vmatprep.subr.bf16.mxu1 %v2224_v19  ;;  %v2307_v18 = vld [vmem:[%s3330_s7 + $0x18c] ss:$16 sps:$4 sm:$0xff]   ;;  %v2302_v19 = vld [vmem:[%s3330_s7 + $0x180] ss:$16 sps:$4 sm:$0xff]   ;;  %v2311_v24 = vld [vmem:[%s3330_s7 + $0x1a8] ss:$16 sps:$4 sm:$0xff]  }
  0x1a   :  { %769 = vmatpush1.bf16.msra.mxu0 %v2242_v43  ;;  %v2308_v23 = vld [vmem:[%s3330_s7 + $0x1a0] ss:$16 sps:$4 sm:$0xff]   ;;  %v2316_v25 = vld [vmem:[%s3330_s7 + $0x1c4] ss:$16 sps:$4 sm:$0xff]  }
  0x1b   :  { %770 = vmatprep.subr.bf16.mxu0 %v2250_v45 }
  0x1c   :  { %255 = vmatpush1.bf16.msra.mxu1 %v2226_v20  ;;  %v2305_v20 = vld [vmem:[%s3330_s7 + $0x188] ss:$16 sps:$4 sm:$0xff]  }
  0x1d   :  { %256 = vmatprep.subr.bf16.mxu1 %v2227_v21  ;;  %v2310_v21 = vld [vmem:[%s3330_s7 + $0x1a4] ss:$16 sps:$4 sm:$0xff]  }
  0x1e   :  { %771 = vmatpush1.bf16.msra.mxu0 %v2248_v47 }
  0x1f   :  { %772 = vmatprep.subr.bf16.mxu0 %v2256_v49 }
  0x20   :  { %257 = vmatpush1.bf16.msra.mxu1 %v2229_v22  ;;  %v2313_v22 = vld [vmem:[%s3330_s7 + $0x1ac] ss:$16 sps:$4 sm:$0xff]  }
  0x21   :  { %805 = vmatprep.subr.bf16.mxu1 %v2235_v26  ;;  %v2319_v26 = vld [vmem:[%s3330_s7 + $0x1cc] ss:$16 sps:$4 sm:$0xff]  }
  0x22   :  { %773 = vmatpush1.bf16.msra.mxu0 %v2254_v51 }
  0x23   :  { %774 = vmatprep.subr.bf16.mxu0 %v2262_v53 }
  0x26   :  { %775 = vmatpush1.bf16.msra.mxu0 %v2260_v55 }
  0x27   :  { %776 = vmatprep.subr.bf16.mxu0 %v2268_v57 }
  0x2a   :  { %777 = vmatpush1.bf16.msra.mxu0 %v2266_v59 }
  0x2b   :  { %778 = vmatprep.subr.bf16.mxu0 %v2274_v61 }
  0x2e   :  { %779 = vmatpush1.bf16.msra.mxu0 %v2272_v63 }
  0x2f   :  { %780 = vmatprep.subr.bf16.mxu0 %v2280_v1 }
  0x32   :  { %781 = vmatpush1.bf16.msra.mxu0 %v2278_v3 }
  0x33   :  { %782 = vmatprep.subr.bf16.mxu0 %v2286_v5 }
  0x36   :  { %783 = vmatpush1.bf16.msra.mxu0 %v2284_v7 }
  0x37   :  { %784 = vmatprep.subr.bf16.mxu0 %v2292_v9 }
  0x3a   :  { %785 = vmatpush1.bf16.msra.mxu0 %v2290_v11 }
  0x3b   :  { %786 = vmatprep.subr.bf16.mxu0 %v2298_v13 }
  0x3e   :  { %787 = vmatpush1.bf16.msra.mxu0 %v2296_v15 }
  0x3f   :  { %788 = vmatprep.subr.bf16.mxu0 %v2304_v17 }
  0x42   :  { %789 = vmatpush1.bf16.msra.mxu0 %v2302_v19  ;;  %v284_v19 = vld [vmem:[%s3335_s6] sm:$0x3] }
  0x43   :  { %790 = vmatprep.subr.bf16.mxu0 %v2310_v21 }
  0x46   :  { %791 = vmatpush1.bf16.msra.mxu0 %v2308_v23 }
  0x47   :  { %792 = vmatprep.subr.bf16.mxu0 %v2316_v25 }
  0xe4   :  { %v124_v28 = vpop.f32.mrb[0].mxu0 }
  0xe5   :  { %v125_v29 = vadd.f32 %v1956_v27, %v124_v28  ;;  %v2185_v30 = vpop.f32.mrb[1].mxu0  ;;  %v2314_v27 = vld [vmem:[%s3330_s7 + $0x1c0] ss:$16 sps:$4 sm:$0xff]   ;;  %v2317_v28 = vld [vmem:[%s3330_s7 + $0x1c8] ss:$16 sps:$4 sm:$0xff]  }
  0xe6   :  { %v127_v31 = vpop.f32.mrb[2].mxu0  ;;  %v2325_v30 = vld [vmem:[%s3330_s7 + $0x1ec] ss:$16 sps:$4 sm:$0xff]   ;;  %793 = vmatpush1.bf16.msra.mxu0 %v2314_v27 }
  0xe7   :  { %vm130_vm2 = vcmp.gt.f32.partialorder %v125_v29, 0.0  ;;  %v131_v32 = vmul.f32 0.2, %v125_v29  ;;  %v2186_v33 = vpop.f32.mrb[3].mxu0  ;;  %v2320_v31 = vld [vmem:[%s3330_s7 + $0x1e0] ss:$16 sps:$4 sm:$0xff]  }
  0xe8   :  { %v2328_v33 = vld [vmem:[%s3332_s11 + $0x4] ss:$16 sps:$4 sm:$0xff]  }
  0xe9   :  { %v132_v34 = vsel %vm130_vm2, %v125_v29, %v131_v32  ;;  %v2322_v29 = vld [vmem:[%s3330_s7 + $0x1e4] ss:$16 sps:$4 sm:$0xff]   ;;  %v2323_v32 = vld [vmem:[%s3330_s7 + $0x1e8] ss:$16 sps:$4 sm:$0xff]  }
  0xea   :  { %v150_v36 = vpack.c.bf16 %v132_v34, %v132_v34  ;;  %794 = vmatprep.subr.bf16.mxu0 %v2322_v29  ;;  %v2331_v34 = vld [vmem:[%s3332_s11 + $0xc] ss:$16 sps:$4 sm:$0xff]  }
  0xeb   :  { %795 = vmatpush1.bf16.msra.mxu0 %v2320_v31 }
  0xec   :  { %275 = vmatmul.mubr.bf16.vlgmr.msra.gmra.mrb[0].mxu1 %v150_v36  ;;  %1780 = vmatprep.subr.bf16.mxu0 %v2328_v33 }
  0xed   :  { %806 = vmatpush1.bf16.msra.mxu1 %v2233_v35  ;;  %v152_v35 = vlaneseq }
  0xee   :  { %807 = vmatprep.subr.bf16.mxu1 %v2241_v38  ;;  %v149_v38 = vld [vmem:[%s3333_s4] sm:$0x3] }
  0xef   :  { %v2875_v36 = vshrl.u32 %v152_v35, 7 }
  0xf1   :  { %808 = vmatpush1.bf16.msra.mxu1 %v2239_v40  ;;  %v2878_v37 = vsub.s32 0, %v2875_v36  ;;  %v2884_v39 = vsub.s32 1, %v2875_v36 }
  0xf2   :  { %809 = vmatprep.subr.bf16.mxu1 %v2247_v42 }
  0xf3   :  { %v155_v40 = vrot.slane %v149_v38, %v2878_v37  ;;  %v159_v41 = vrot.slane %v149_v38, %v2884_v39  ;;  %v341_v25 = vrot.slane %v284_v19, %v2878_v37  ;;  %v345_v27 = vrot.slane %v284_v19, %v2884_v39  ;;  %v2394_v19 = vld [vmem:[%s3332_s11 + $0x164] ss:$16 sps:$4 sm:$0xff]  }
  0xf5   :  { %810 = vmatpush1.bf16.msra.mxu1 %v2245_v44 }
  0xf6   :  { %811 = vmatprep.subr.bf16.mxu1 %v2253_v46 }
  0xf9   :  { %812 = vmatpush1.bf16.msra.mxu1 %v2251_v48 }
  0xfa   :  { %813 = vmatprep.subr.bf16.mxu1 %v2259_v50 }
  0xfd   :  { %814 = vmatpush1.bf16.msra.mxu1 %v2257_v52 }
  0xfe   :  { %815 = vmatprep.subr.bf16.mxu1 %v2265_v54 }
 0x101   :  { %816 = vmatpush1.bf16.msra.mxu1 %v2263_v56 }
 0x102   :  { %817 = vmatprep.subr.bf16.mxu1 %v2271_v58 }
 0x105   :  { %818 = vmatpush1.bf16.msra.mxu1 %v2269_v60 }
 0x106   :  { %819 = vmatprep.subr.bf16.mxu1 %v2277_v62 }
 0x109   :  { %820 = vmatpush1.bf16.msra.mxu1 %v2275_v0 }
 0x10a   :  { %821 = vmatprep.subr.bf16.mxu1 %v2283_v2 }
 0x10d   :  { %822 = vmatpush1.bf16.msra.mxu1 %v2281_v4 }
 0x10e   :  { %823 = vmatprep.subr.bf16.mxu1 %v2289_v6 }
 0x111   :  { %824 = vmatpush1.bf16.msra.mxu1 %v2287_v8 }
 0x112   :  { %825 = vmatprep.subr.bf16.mxu1 %v2295_v10 }
 0x115   :  { %826 = vmatpush1.bf16.msra.mxu1 %v2293_v12 }
 0x116   :  { %827 = vmatprep.subr.bf16.mxu1 %v2301_v14 }
 0x119   :  { %828 = vmatpush1.bf16.msra.mxu1 %v2299_v16 }
 0x11a   :  { %829 = vmatprep.subr.bf16.mxu1 %v2307_v18  ;;  %v283_v18 = vld [vmem:[%s3334_s5] sm:$0x3] }
 0x11d   :  { %830 = vmatpush1.bf16.msra.mxu1 %v2305_v20  ;;  %v328_v20 = vrot.slane %v283_v18, %v2878_v37 }
 0x11e   :  { %831 = vmatprep.subr.bf16.mxu1 %v2313_v22  ;;  %v332_v22 = vrot.slane %v283_v18, %v2884_v39  ;;  %v2389_v18 = vld [vmem:[%s3332_s11 + $0x148] ss:$16 sps:$4 sm:$0xff]  }
 0x121   :  { %832 = vmatpush1.bf16.msra.mxu1 %v2311_v24 }
 0x122   :  { %833 = vmatprep.subr.bf16.mxu1 %v2319_v26 }
 0x125   :  { %834 = vmatpush1.bf16.msra.mxu1 %v2317_v28 }
 0x126   :  { %835 = vmatprep.subr.bf16.mxu1 %v2325_v30 }
 0x129   :  { %836 = vmatpush1.bf16.msra.mxu1 %v2323_v32 }
 0x12a   :  { %1862 = vmatprep.subr.bf16.mxu1 %v2331_v34 }
 0x1bf   :  { %v276_v42 = vpop.f32.mrb[0].mxu1 }
 0x1c0   :  { %v277_v43 = vadd.f32 %v276_v42, %v155_v40  ;;  %v278_v44 = vpop.f32.mrb[1].mxu1  ;;  %v2326_v40 = vld [vmem:[%s3332_s11] ss:$16 sps:$4 sm:$0xff]  }
 0x1c1   :  { %v279_v45 = vadd.f32 %v278_v44, %v159_v41  ;;  %v280_v46 = vpop.f32.mrb[2].mxu1  ;;  %v2329_v41 = vld [vmem:[%s3332_s11 + $0x8] ss:$16 sps:$4 sm:$0xff]   ;;  %v2337_v44 = vld [vmem:[%s3332_s11 + $0x2c] ss:$16 sps:$4 sm:$0xff]  }
 0x1c2   :  { %v285_v47 = vrot.slane %v277_v43, 4  ;;  %v281_v48 = vpop.f32.mrb[3].mxu1  ;;  %v2335_v46 = vld [vmem:[%s3332_s11 + $0x28] ss:$16 sps:$4 sm:$0xff]  }
 0x1c3   :  { %v291_v49 = vrot.slane %v279_v45, 4  ;;  %v2343_v48 = vld [vmem:[%s3332_s11 + $0x4c] ss:$16 sps:$4 sm:$0xff]  }
 0x1c4   :  { %v286_v50 = vadd.f32 %v285_v47, %v277_v43  ;;  %v2340_v47 = vld [vmem:[%s3332_s11 + $0x44] ss:$16 sps:$4 sm:$0xff]  }
 0x1c5   :  { %v292_v51 = vadd.f32 %v291_v49, %v279_v45  ;;  %v2338_v49 = vld [vmem:[%s3332_s11 + $0x40] ss:$16 sps:$4 sm:$0xff]  }
 0x1c6   :  { %v287_v52 = vrot.slane %v286_v50, 2 }
 0x1c7   :  { %v293_v53 = vrot.slane %v292_v51, 2 }
 0x1c8   :  { %v288_v54 = vadd.f32 %v287_v52, %v286_v50  ;;  %v2341_v50 = vld [vmem:[%s3332_s11 + $0x48] ss:$16 sps:$4 sm:$0xff]   ;;  %v2349_v52 = vld [vmem:[%s3332_s11 + $0x6c] ss:$16 sps:$4 sm:$0xff]  }
 0x1c9   :  { %v294_v55 = vadd.f32 %v293_v53, %v292_v51  ;;  %v2346_v51 = vld [vmem:[%s3332_s11 + $0x64] ss:$16 sps:$4 sm:$0xff]   ;;  %v2344_v53 = vld [vmem:[%s3332_s11 + $0x60] ss:$16 sps:$4 sm:$0xff]  }
 0x1ca   :  { %v289_v56 = vrot.slane %v288_v54, 1 }
 0x1cb   :  { %v295_v57 = vrot.slane %v294_v55, 1 }
 0x1cc   :  { %v290_v58 = vadd.f32 %v289_v56, %v288_v54  ;;  %v2347_v54 = vld [vmem:[%s3332_s11 + $0x68] ss:$16 sps:$4 sm:$0xff]   ;;  %v2355_v56 = vld [vmem:[%s3332_s11 + $0x8c] ss:$16 sps:$4 sm:$0xff]  }
 0x1cd   :  { %v296_v59 = vadd.f32 %v295_v57, %v294_v55  ;;  %v2352_v55 = vld [vmem:[%s3332_s11 + $0x84] ss:$16 sps:$4 sm:$0xff]   ;;  %v2350_v57 = vld [vmem:[%s3332_s11 + $0x80] ss:$16 sps:$4 sm:$0xff]  }
 0x1ce   :  { %v298_v60 = vmul.f32 0.125, %v290_v58  ;;  %v2353_v58 = vld [vmem:[%s3332_s11 + $0x88] ss:$16 sps:$4 sm:$0xff]  }
 0x1cf   :  { %v299_v61 = vmul.f32 0.125, %v296_v59  ;;  %v2358_v59 = vld [vmem:[%s3332_s11 + $0xa4] ss:$16 sps:$4 sm:$0xff]  }
 0x1d0   :  { %v300_v62 = vsub.f32 %v277_v43, %v298_v60  ;;  %v2334_v43 = vld [vmem:[%s3332_s11 + $0x24] ss:$16 sps:$4 sm:$0xff]   ;;  %v2361_v60 = vld [vmem:[%s3332_s11 + $0xac] ss:$16 sps:$4 sm:$0xff]  }
 0x1d1   :  { %v301_v63 = vsub.f32 %v279_v45, %v299_v61  ;;  %v2332_v45 = vld [vmem:[%s3332_s11 + $0x20] ss:$16 sps:$4 sm:$0xff]  }
 0x1d2   :  { %v302_v0 = vmul.f32 %v300_v62, %v300_v62  ;;  %v2356_v61 = vld [vmem:[%s3332_s11 + $0xa0] ss:$16 sps:$4 sm:$0xff]  }
 0x1d3   :  { %v303_v1 = vmul.f32 %v301_v63, %v301_v63 }
 0x1d4   :  { %v304_v2 = vrot.slane %v302_v0, 4 }
 0x1d5   :  { %v310_v3 = vrot.slane %v303_v1, 4 }
 0x1d6   :  { %v305_v4 = vadd.f32 %v304_v2, %v302_v0  ;;  %v2367_v0 = vld [vmem:[%s3332_s11 + $0xcc] ss:$16 sps:$4 sm:$0xff]   ;;  %v2365_v2 = vld [vmem:[%s3332_s11 + $0xc8] ss:$16 sps:$4 sm:$0xff]  }
 0x1d7   :  { %v311_v5 = vadd.f32 %v310_v3, %v303_v1  ;;  %v2362_v1 = vld [vmem:[%s3332_s11 + $0xc0] ss:$16 sps:$4 sm:$0xff]   ;;  %v2370_v3 = vld [vmem:[%s3332_s11 + $0xe4] ss:$16 sps:$4 sm:$0xff]  }
 0x1d8   :  { %v306_v6 = vrot.slane %v305_v4, 2 }
 0x1d9   :  { %v312_v7 = vrot.slane %v311_v5, 2 }
 0x1da   :  { %v307_v8 = vadd.f32 %v306_v6, %v305_v4  ;;  %v2373_v4 = vld [vmem:[%s3332_s11 + $0xec] ss:$16 sps:$4 sm:$0xff]   ;;  %v2371_v6 = vld [vmem:[%s3332_s11 + $0xe8] ss:$16 sps:$4 sm:$0xff]  }
 0x1db   :  { %v313_v9 = vadd.f32 %v312_v7, %v311_v5  ;;  %v2368_v5 = vld [vmem:[%s3332_s11 + $0xe0] ss:$16 sps:$4 sm:$0xff]   ;;  %v2376_v7 = vld [vmem:[%s3332_s11 + $0x104] ss:$16 sps:$4 sm:$0xff]  }
 0x1dc   :  { %v308_v10 = vrot.slane %v307_v8, 1 }
 0x1dd   :  { %v314_v11 = vrot.slane %v313_v9, 1 }
 0x1de   :  { %v309_v12 = vadd.f32 %v308_v10, %v307_v8  ;;  %v2379_v8 = vld [vmem:[%s3332_s11 + $0x10c] ss:$16 sps:$4 sm:$0xff]   ;;  %v2377_v10 = vld [vmem:[%s3332_s11 + $0x108] ss:$16 sps:$4 sm:$0xff]  }
 0x1df   :  { %v315_v13 = vadd.f32 %v314_v11, %v313_v9  ;;  %v2374_v9 = vld [vmem:[%s3332_s11 + $0x100] ss:$16 sps:$4 sm:$0xff]   ;;  %v2382_v11 = vld [vmem:[%s3332_s11 + $0x124] ss:$16 sps:$4 sm:$0xff]  }
 0x1e0   :  { %v316_v14 = vmul.f32 0.125, %v309_v12  ;;  %v2385_v12 = vld [vmem:[%s3332_s11 + $0x12c] ss:$16 sps:$4 sm:$0xff]  }
 0x1e1   :  { %v317_v15 = vmul.f32 0.125, %v315_v13  ;;  %v2380_v13 = vld [vmem:[%s3332_s11 + $0x120] ss:$16 sps:$4 sm:$0xff]  }
 0x1e2   :  { %v318_v16 = vadd.f32 0.8, %v316_v14  ;;  %v2383_v14 = vld [vmem:[%s3332_s11 + $0x128] ss:$16 sps:$4 sm:$0xff]  }
 0x1e3   :  { %v319_v17 = vadd.f32 0.8, %v317_v15  ;;  %v2388_v15 = vld [vmem:[%s3332_s11 + $0x144] ss:$16 sps:$4 sm:$0xff]  }
 0x1e4   :  { %2518 = vrsqrt.f32 %v318_v16  ;;  %v2391_v16 = vld [vmem:[%s3332_s11 + $0x14c] ss:$16 sps:$4 sm:$0xff]  }
 0x1e5   :  { %2520 = vrsqrt.f32 %v319_v17  ;;  %v2386_v17 = vld [vmem:[%s3332_s11 + $0x140] ss:$16 sps:$4 sm:$0xff]  }
 0x1ee   :  { %v2519_v21 = vpop.eup %2518 }
 0x1ef   :  { %v2521_v23 = vpop.eup %2520  ;;  %v322_v24 = vmul.f32 %v2519_v21, %v300_v62  ;;  %v2359_v62 = vld [vmem:[%s3332_s11 + $0xa8] ss:$16 sps:$4 sm:$0xff]   ;;  %v2392_v21 = vld [vmem:[%s3332_s11 + $0x160] ss:$16 sps:$4 sm:$0xff]  }
 0x1f0   :  { %v323_v26 = vmul.f32 %v2521_v23, %v301_v63  ;;  %v2364_v63 = vld [vmem:[%s3332_s11 + $0xc4] ss:$16 sps:$4 sm:$0xff]  }
 0x1f1   :  { %v335_v28 = vmul.f32 %v328_v20, %v322_v24  ;;  %v2397_v20 = vld [vmem:[%s3332_s11 + $0x16c] ss:$16 sps:$4 sm:$0xff]   ;;  %v2400_v23 = vld [vmem:[%s3332_s11 + $0x184] ss:$16 sps:$4 sm:$0xff]  }
 0x1f2   :  { %v336_v29 = vmul.f32 %v332_v22, %v323_v26  ;;  %v2395_v22 = vld [vmem:[%s3332_s11 + $0x168] ss:$16 sps:$4 sm:$0xff]   ;;  %v2403_v24 = vld [vmem:[%s3332_s11 + $0x18c] ss:$16 sps:$4 sm:$0xff]  }
 0x1f3   :  { %v348_v30 = vadd.f32 %v341_v25, %v335_v28  ;;  %v2398_v25 = vld [vmem:[%s3332_s11 + $0x180] ss:$16 sps:$4 sm:$0xff]   ;;  %v2401_v26 = vld [vmem:[%s3332_s11 + $0x188] ss:$16 sps:$4 sm:$0xff]   ;;  %v2409_v28 = vld [vmem:[%s3332_s11 + $0x1ac] ss:$16 sps:$4 sm:$0xff]  }
 0x1f4   :  { %v349_v31 = vadd.f32 %v345_v27, %v336_v29  ;;  %v2406_v27 = vld [vmem:[%s3332_s11 + $0x1a4] ss:$16 sps:$4 sm:$0xff]   ;;  %v2404_v29 = vld [vmem:[%s3332_s11 + $0x1a0] ss:$16 sps:$4 sm:$0xff]  }
 0x1f5   :  { %vm350_vm3 = vcmp.gt.f32.partialorder %v348_v30, 0.0  ;;  %v352_v32 = vmul.f32 0.2, %v348_v30 }
 0x1f6   :  { %vm351_vm4 = vcmp.gt.f32.partialorder %v349_v31, 0.0  ;;  %v353_v33 = vmul.f32 0.2, %v349_v31 }
 0x1f7   :  { %v354_v34 = vsel %vm350_vm3, %v348_v30, %v352_v32  ;;  %v2407_v30 = vld [vmem:[%s3332_s11 + $0x1a8] ss:$16 sps:$4 sm:$0xff]   ;;  %v2415_v32 = vld [vmem:[%s3332_s11 + $0x1cc] ss:$16 sps:$4 sm:$0xff]  }
 0x1f8   :  { %v355_v35 = vsel %vm351_vm4, %v349_v31, %v353_v33  ;;  %v421_v42 = vpack.c.bf16 %v354_v34, %v354_v34  ;;  %v2412_v31 = vld [vmem:[%s3332_s11 + $0x1c4] ss:$16 sps:$4 sm:$0xff]   ;;  %v2410_v33 = vld [vmem:[%s3332_s11 + $0x1c0] ss:$16 sps:$4 sm:$0xff]   ;;  %v2413_v34 = vld [vmem:[%s3332_s11 + $0x1c8] ss:$16 sps:$4 sm:$0xff]  }
 0x1f9   :  { %v422_v38 = vpack.c.bf16 %v355_v35, %v355_v35  ;;  %v2418_v35 = vld [vmem:[%s3332_s11 + $0x1e4] ss:$16 sps:$4 sm:$0xff]  }
 0x1fb   :  { %796 = vmatprep.mubr.bf16.mxu0 %v422_v38  ;;  %837 = vmatprep.mubr.bf16.mxu1 %v422_v38  ;;  %v2421_v38 = vld [vmem:[%s3332_s11 + $0x1ec] ss:$16 sps:$4 sm:$0xff]  }
 0x1fc   :  { %797 = vmatmul.mubr.bf16.vlgmr.msra.gmra.mrb[4].mxu0 %v421_v42  ;;  %838 = vmatmul.mubr.bf16.vlgmr.msra.gmra.mrb[4].mxu1 %v421_v42  ;;  %v2424_v42 = vld [vmem:[%s3332_s11 + $0x204] ss:$16 sps:$4 sm:$0xff]  }
 0x1fd   :  { %1781 = vmatpush1.bf16.msra.mxu0 %v2326_v40  ;;  %1863 = vmatpush1.bf16.msra.mxu1 %v2329_v41  ;;  %v2416_v40 = vld [vmem:[%s3332_s11 + $0x1e0] ss:$16 sps:$4 sm:$0xff]   ;;  %v2419_v41 = vld [vmem:[%s3332_s11 + $0x1e8] ss:$16 sps:$4 sm:$0xff]  }
 0x1fe   :  { %1782 = vmatprep.subr.bf16.mxu0 %v2334_v43  ;;  %1864 = vmatprep.subr.bf16.mxu1 %v2337_v44  ;;  %v2427_v43 = vld [vmem:[%s3332_s11 + $0x20c] ss:$16 sps:$4 sm:$0xff]   ;;  %v3091_v44 = vsub.s32 2, %v2875_v36 }
 0x201   :  { %1783 = vmatpush1.bf16.msra.mxu0 %v2332_v45  ;;  %1865 = vmatpush1.bf16.msra.mxu1 %v2335_v46  ;;  %v420_v45 = vld [vmem:[%s3336_s8] sm:$0xf]  ;;  %v3097_v46 = vsub.s32 3, %v2875_v36 }
 0x202   :  { %1784 = vmatprep.subr.bf16.mxu0 %v2340_v47  ;;  %1866 = vmatprep.subr.bf16.mxu1 %v2343_v48  ;;  %v427_v47 = vrot.slane %v420_v45, %v2878_v37  ;;  %v435_v48 = vrot.slane %v420_v45, %v3091_v44 }
 0x205   :  { %1785 = vmatpush1.bf16.msra.mxu0 %v2338_v49  ;;  %1867 = vmatpush1.bf16.msra.mxu1 %v2341_v50  ;;  %v431_v49 = vrot.slane %v420_v45, %v2884_v39  ;;  %v439_v50 = vrot.slane %v420_v45, %v3097_v46 }
 0x206   :  { %1786 = vmatprep.subr.bf16.mxu0 %v2346_v51  ;;  %1868 = vmatprep.subr.bf16.mxu1 %v2349_v52 }
 0x209   :  { %1787 = vmatpush1.bf16.msra.mxu0 %v2344_v53  ;;  %1869 = vmatpush1.bf16.msra.mxu1 %v2347_v54 }
 0x20a   :  { %1788 = vmatprep.subr.bf16.mxu0 %v2352_v55  ;;  %1870 = vmatprep.subr.bf16.mxu1 %v2355_v56 }
 0x20d   :  { %1789 = vmatpush1.bf16.msra.mxu0 %v2350_v57  ;;  %1871 = vmatpush1.bf16.msra.mxu1 %v2353_v58 }
 0x20e   :  { %1790 = vmatprep.subr.bf16.mxu0 %v2358_v59  ;;  %1872 = vmatprep.subr.bf16.mxu1 %v2361_v60 }
 0x211   :  { %1791 = vmatpush1.bf16.msra.mxu0 %v2356_v61  ;;  %1873 = vmatpush1.bf16.msra.mxu1 %v2359_v62 }
 0x212   :  { %1792 = vmatprep.subr.bf16.mxu0 %v2364_v63  ;;  %1874 = vmatprep.subr.bf16.mxu1 %v2367_v0 }
 0x215   :  { %1793 = vmatpush1.bf16.msra.mxu0 %v2362_v1  ;;  %1875 = vmatpush1.bf16.msra.mxu1 %v2365_v2 }
 0x216   :  { %1794 = vmatprep.subr.bf16.mxu0 %v2370_v3  ;;  %1876 = vmatprep.subr.bf16.mxu1 %v2373_v4 }
 0x219   :  { %1795 = vmatpush1.bf16.msra.mxu0 %v2368_v5  ;;  %1877 = vmatpush1.bf16.msra.mxu1 %v2371_v6 }
 0x21a   :  { %1796 = vmatprep.subr.bf16.mxu0 %v2376_v7  ;;  %1878 = vmatprep.subr.bf16.mxu1 %v2379_v8 }
 0x21d   :  { %1797 = vmatpush1.bf16.msra.mxu0 %v2374_v9  ;;  %1879 = vmatpush1.bf16.msra.mxu1 %v2377_v10 }
 0x21e   :  { %1798 = vmatprep.subr.bf16.mxu0 %v2382_v11  ;;  %1880 = vmatprep.subr.bf16.mxu1 %v2385_v12 }
 0x221   :  { %1799 = vmatpush1.bf16.msra.mxu0 %v2380_v13  ;;  %1881 = vmatpush1.bf16.msra.mxu1 %v2383_v14 }
 0x222   :  { %1800 = vmatprep.subr.bf16.mxu0 %v2388_v15  ;;  %1882 = vmatprep.subr.bf16.mxu1 %v2391_v16 }
 0x225   :  { %1801 = vmatpush1.bf16.msra.mxu0 %v2386_v17  ;;  %1883 = vmatpush1.bf16.msra.mxu1 %v2389_v18 }
 0x226   :  { %1802 = vmatprep.subr.bf16.mxu0 %v2394_v19  ;;  %1884 = vmatprep.subr.bf16.mxu1 %v2397_v20 }
 0x229   :  { %1803 = vmatpush1.bf16.msra.mxu0 %v2392_v21  ;;  %1885 = vmatpush1.bf16.msra.mxu1 %v2395_v22 }
 0x22a   :  { %1804 = vmatprep.subr.bf16.mxu0 %v2400_v23  ;;  %1886 = vmatprep.subr.bf16.mxu1 %v2403_v24 }
 0x22d   :  { %1805 = vmatpush1.bf16.msra.mxu0 %v2398_v25  ;;  %1887 = vmatpush1.bf16.msra.mxu1 %v2401_v26 }
 0x22e   :  { %1806 = vmatprep.subr.bf16.mxu0 %v2406_v27  ;;  %1888 = vmatprep.subr.bf16.mxu1 %v2409_v28 }
 0x231   :  { %1807 = vmatpush1.bf16.msra.mxu0 %v2404_v29  ;;  %1889 = vmatpush1.bf16.msra.mxu1 %v2407_v30 }
 0x232   :  { %1808 = vmatprep.subr.bf16.mxu0 %v2412_v31  ;;  %1890 = vmatprep.subr.bf16.mxu1 %v2415_v32 }
 0x235   :  { %1809 = vmatpush1.bf16.msra.mxu0 %v2410_v33  ;;  %1891 = vmatpush1.bf16.msra.mxu1 %v2413_v34 }
 0x236   :  { %1810 = vmatprep.subr.bf16.mxu0 %v2418_v35  ;;  %1892 = vmatprep.subr.bf16.mxu1 %v2421_v38 }
 0x239   :  { %1811 = vmatpush1.bf16.msra.mxu0 %v2416_v40  ;;  %1893 = vmatpush1.bf16.msra.mxu1 %v2419_v41 }
 0x23a   :  { %1821 = vmatprep.subr.bf16.mxu0 %v2424_v42  ;;  %1903 = vmatprep.subr.bf16.mxu1 %v2427_v43 }
 0x2cf   :  { %v798_v51 = vpop.f32.mrb[4].mxu0  ;;  %v839_v52 = vpop.f32.mrb[4].mxu1 }
 0x2d0   :  { %v799_v53 = vadd.f32 %v798_v51, %v427_v47  ;;  %v840_v54 = vadd.f32 %v839_v52, %v435_v48  ;;  %v800_v55 = vpop.f32.mrb[5].mxu0  ;;  %v841_v56 = vpop.f32.mrb[5].mxu1 }
 0x2d1   :  { %v801_v57 = vadd.f32 %v800_v55, %v431_v49  ;;  %v842_v58 = vadd.f32 %v841_v56, %v439_v50  ;;  %v802_v59 = vpop.f32.mrb[6].mxu0  ;;  %v843_v60 = vpop.f32.mrb[6].mxu1 }
 0x2d2   :  { %v848_v36 = vrot.slane %v799_v53, 4  ;;  %v860_v61 = vrot.slane %v840_v54, 4  ;;  %v803_v62 = vpop.f32.mrb[7].mxu0  ;;  %v844_v63 = vpop.f32.mrb[7].mxu1 }
 0x2d3   :  { %v854_v0 = vrot.slane %v801_v57, 4  ;;  %v866_v1 = vrot.slane %v842_v58, 4 }
 0x2d4   :  { %v849_v2 = vadd.f32 %v848_v36, %v799_v53  ;;  %v861_v3 = vadd.f32 %v860_v61, %v840_v54 }
 0x2d5   :  { %v855_v4 = vadd.f32 %v854_v0, %v801_v57  ;;  %v867_v5 = vadd.f32 %v866_v1, %v842_v58 }
 0x2d6   :  { %v850_v6 = vrot.slane %v849_v2, 2  ;;  %v862_v7 = vrot.slane %v861_v3, 2 }
 0x2d7   :  { %v856_v8 = vrot.slane %v855_v4, 2  ;;  %v868_v9 = vrot.slane %v867_v5, 2 }
 0x2d8   :  { %v851_v10 = vadd.f32 %v850_v6, %v849_v2  ;;  %v863_v11 = vadd.f32 %v862_v7, %v861_v3  ;;  %v846_v6 = vld [vmem:[%s3337_s9] sm:$0xf] }
 0x2d9   :  { %v857_v12 = vadd.f32 %v856_v8, %v855_v4  ;;  %v869_v13 = vadd.f32 %v868_v9, %v867_v5  ;;  %v847_v7 = vld [vmem:[%s3338_s10] sm:$0xf]  ;;  %v928_v8 = vrot.slane %v846_v6, %v2878_v37 }
 0x2da   :  { %v852_v14 = vrot.slane %v851_v10, 1  ;;  %v864_v15 = vrot.slane %v863_v11, 1 }
 0x2db   :  { %v858_v16 = vrot.slane %v857_v12, 1  ;;  %v870_v17 = vrot.slane %v869_v13, 1 }
 0x2dc   :  { %v853_v18 = vadd.f32 %v852_v14, %v851_v10  ;;  %v865_v19 = vadd.f32 %v864_v15, %v863_v11  ;;  %v936_v10 = vrot.slane %v846_v6, %v3091_v44  ;;  %v932_v14 = vrot.slane %v846_v6, %v2884_v39 }
 0x2dd   :  { %v859_v20 = vadd.f32 %v858_v16, %v857_v12  ;;  %v871_v21 = vadd.f32 %v870_v17, %v869_v13  ;;  %v953_v13 = vrot.slane %v847_v7, %v2878_v37  ;;  %v961_v17 = vrot.slane %v847_v7, %v3091_v44 }
 0x2de   :  { %v872_v22 = vmul.f32 0.125, %v853_v18  ;;  %v874_v23 = vmul.f32 0.125, %v865_v19  ;;  %v940_v18 = vrot.slane %v846_v6, %v3097_v46  ;;  %v2461_v6 = vld [vmem:[%s3332_s11 + $0x2c8] ss:$16 sps:$4 sm:$0xff]  }
 0x2df   :  { %v873_v24 = vmul.f32 0.125, %v859_v20  ;;  %v875_v25 = vmul.f32 0.125, %v871_v21 }
 0x2e0   :  { %v876_v26 = vsub.f32 %v799_v53, %v872_v22  ;;  %v878_v27 = vsub.f32 %v840_v54, %v874_v23  ;;  %v957_v22 = vrot.slane %v847_v7, %v2884_v39 }
 0x2e1   :  { %v877_v28 = vsub.f32 %v801_v57, %v873_v24  ;;  %v879_v29 = vsub.f32 %v842_v58, %v875_v25  ;;  %v965_v25 = vrot.slane %v847_v7, %v3097_v46  ;;  %v2466_v7 = vld [vmem:[%s3332_s11 + $0x2e4] ss:$16 sps:$4 sm:$0xff]  }
 0x2e2   :  { %v880_v30 = vmul.f32 %v876_v26, %v876_v26  ;;  %v882_v31 = vmul.f32 %v878_v27, %v878_v27 }
 0x2e3   :  { %v881_v32 = vmul.f32 %v877_v28, %v877_v28  ;;  %v883_v33 = vmul.f32 %v879_v29, %v879_v29 }
 0x2e4   :  { %v884_v34 = vrot.slane %v880_v30, 4  ;;  %v896_v35 = vrot.slane %v882_v31, 4 }
 0x2e5   :  { %v890_v38 = vrot.slane %v881_v32, 4  ;;  %v902_v40 = vrot.slane %v883_v33, 4 }
 0x2e6   :  { %v885_v41 = vadd.f32 %v884_v34, %v880_v30  ;;  %v897_v42 = vadd.f32 %v896_v35, %v882_v31 }
 0x2e7   :  { %v891_v43 = vadd.f32 %v890_v38, %v881_v32  ;;  %v903_v45 = vadd.f32 %v902_v40, %v883_v33 }
 0x2e8   :  { %v886_v47 = vrot.slane %v885_v41, 2  ;;  %v898_v48 = vrot.slane %v897_v42, 2 }
 0x2e9   :  { %v892_v49 = vrot.slane %v891_v43, 2  ;;  %v904_v50 = vrot.slane %v903_v45, 2 }
 0x2ea   :  { %v887_v51 = vadd.f32 %v886_v47, %v885_v41  ;;  %v899_v52 = vadd.f32 %v898_v48, %v897_v42  ;;  %v2425_v42 = vld [vmem:[%s3332_s11 + $0x208] ss:$16 sps:$4 sm:$0xff]   ;;  %v2430_v47 = vld [vmem:[%s3332_s11 + $0x224] ss:$16 sps:$4 sm:$0xff]   ;;  %v2433_v48 = vld [vmem:[%s3332_s11 + $0x22c] ss:$16 sps:$4 sm:$0xff]  }
 0x2eb   :  { %v893_v53 = vadd.f32 %v892_v49, %v891_v43  ;;  %v905_v54 = vadd.f32 %v904_v50, %v903_v45  ;;  %v2428_v50 = vld [vmem:[%s3332_s11 + $0x220] ss:$16 sps:$4 sm:$0xff]  }
 0x2ec   :  { %v888_v55 = vrot.slane %v887_v51, 1  ;;  %v900_v56 = vrot.slane %v899_v52, 1 }
 0x2ed   :  { %v894_v57 = vrot.slane %v893_v53, 1  ;;  %v906_v58 = vrot.slane %v905_v54, 1 }
 0x2ee   :  { %v889_v59 = vadd.f32 %v888_v55, %v887_v51  ;;  %v901_v60 = vadd.f32 %v900_v56, %v899_v52  ;;  %v2431_v51 = vld [vmem:[%s3332_s11 + $0x228] ss:$16 sps:$4 sm:$0xff]   ;;  %v2436_v52 = vld [vmem:[%s3332_s11 + $0x244] ss:$16 sps:$4 sm:$0xff]  }
 0x2ef   :  { %v895_v36 = vadd.f32 %v894_v57, %v893_v53  ;;  %v907_v61 = vadd.f32 %v906_v58, %v905_v54  ;;  %v2439_v53 = vld [vmem:[%s3332_s11 + $0x24c] ss:$16 sps:$4 sm:$0xff]   ;;  %v2434_v54 = vld [vmem:[%s3332_s11 + $0x240] ss:$16 sps:$4 sm:$0xff]   ;;  %v2437_v55 = vld [vmem:[%s3332_s11 + $0x248] ss:$16 sps:$4 sm:$0xff]  }
 0x2f0   :  { %v908_v62 = vmul.f32 0.125, %v889_v59  ;;  %v910_v63 = vmul.f32 0.125, %v901_v60  ;;  %v2442_v56 = vld [vmem:[%s3332_s11 + $0x264] ss:$16 sps:$4 sm:$0xff]   ;;  %v2445_v57 = vld [vmem:[%s3332_s11 + $0x26c] ss:$16 sps:$4 sm:$0xff]  }
 0x2f1   :  { %v909_v0 = vmul.f32 0.125, %v895_v36  ;;  %v911_v1 = vmul.f32 0.125, %v907_v61  ;;  %v2440_v58 = vld [vmem:[%s3332_s11 + $0x260] ss:$16 sps:$4 sm:$0xff]   ;;  %v2443_v59 = vld [vmem:[%s3332_s11 + $0x268] ss:$16 sps:$4 sm:$0xff]  }
 0x2f2   :  { %v912_v2 = vadd.f32 0.8, %v908_v62  ;;  %v914_v3 = vadd.f32 0.8, %v910_v63  ;;  %v2448_v60 = vld [vmem:[%s3332_s11 + $0x284] ss:$16 sps:$4 sm:$0xff]  }
 0x2f3   :  { %v913_v4 = vadd.f32 0.8, %v909_v0  ;;  %v915_v5 = vadd.f32 0.8, %v911_v1  ;;  %v2451_v36 = vld [vmem:[%s3332_s11 + $0x28c] ss:$16 sps:$4 sm:$0xff]  }
 0x2f4   :  { %2522 = vrsqrt.f32 %v912_v2  ;;  %v2446_v61 = vld [vmem:[%s3332_s11 + $0x280] ss:$16 sps:$4 sm:$0xff]   ;;  %v2449_v62 = vld [vmem:[%s3332_s11 + $0x288] ss:$16 sps:$4 sm:$0xff]   ;;  %v2454_v63 = vld [vmem:[%s3332_s11 + $0x2a4] ss:$16 sps:$4 sm:$0xff]  }
 0x2f5   :  { %2524 = vrsqrt.f32 %v914_v3  ;;  %v2457_v0 = vld [vmem:[%s3332_s11 + $0x2ac] ss:$16 sps:$4 sm:$0xff]   ;;  %v2452_v1 = vld [vmem:[%s3332_s11 + $0x2a0] ss:$16 sps:$4 sm:$0xff]   ;;  %v2455_v2 = vld [vmem:[%s3332_s11 + $0x2a8] ss:$16 sps:$4 sm:$0xff]  }
 0x2f6   :  { %2526 = vrsqrt.f32 %v913_v4  ;;  %v2460_v3 = vld [vmem:[%s3332_s11 + $0x2c4] ss:$16 sps:$4 sm:$0xff]   ;;  %v2463_v4 = vld [vmem:[%s3332_s11 + $0x2cc] ss:$16 sps:$4 sm:$0xff]  }
 0x2f7   :  { %2528 = vrsqrt.f32 %v915_v5  ;;  %v2458_v5 = vld [vmem:[%s3332_s11 + $0x2c0] ss:$16 sps:$4 sm:$0xff]  }
 0x2fe   :  { %v2523_v9 = vpop.eup %2522 }
 0x2ff   :  { %v2525_v11 = vpop.eup %2524  ;;  %v920_v12 = vmul.f32 %v2523_v9, %v876_v26  ;;  %v2464_v9 = vld [vmem:[%s3332_s11 + $0x2e0] ss:$16 sps:$4 sm:$0xff]  }
 0x300   :  { %v2527_v15 = vpop.eup %2526  ;;  %v922_v16 = vmul.f32 %v2525_v11, %v878_v27  ;;  %v2472_v11 = vld [vmem:[%s3332_s11 + $0x304] ss:$16 sps:$4 sm:$0xff]  }
 0x301   :  { %v2529_v19 = vpop.eup %2528  ;;  %v945_v20 = vmul.f32 %v928_v8, %v920_v12  ;;  %v921_v21 = vmul.f32 %v2527_v15, %v877_v28  ;;  %v2469_v8 = vld [vmem:[%s3332_s11 + $0x2ec] ss:$16 sps:$4 sm:$0xff]   ;;  %v2478_v15 = vld [vmem:[%s3332_s11 + $0x324] ss:$16 sps:$4 sm:$0xff]  }
 0x302   :  { %v947_v23 = vmul.f32 %v936_v10, %v922_v16  ;;  %v923_v24 = vmul.f32 %v2529_v19, %v879_v29  ;;  %v2422_v29 = vld [vmem:[%s3332_s11 + $0x200] ss:$16 sps:$4 sm:$0xff]   ;;  %v2467_v10 = vld [vmem:[%s3332_s11 + $0x2e8] ss:$16 sps:$4 sm:$0xff]   ;;  %v2475_v12 = vld [vmem:[%s3332_s11 + $0x30c] ss:$16 sps:$4 sm:$0xff]  }
 0x303   :  { %v970_v26 = vadd.f32 %v953_v13, %v945_v20  ;;  %v946_v30 = vmul.f32 %v932_v14, %v921_v21  ;;  %v2470_v13 = vld [vmem:[%s3332_s11 + $0x300] ss:$16 sps:$4 sm:$0xff]   ;;  %v2473_v14 = vld [vmem:[%s3332_s11 + $0x308] ss:$16 sps:$4 sm:$0xff]   ;;  %v2481_v16 = vld [vmem:[%s3332_s11 + $0x32c] ss:$16 sps:$4 sm:$0xff]  }
 0x304   :  { %v3117_v31 = vadd.f32 %v961_v17, %v947_v23  ;;  %v948_v32 = vmul.f32 %v940_v18, %v923_v24  ;;  %v2476_v17 = vld [vmem:[%s3332_s11 + $0x320] ss:$16 sps:$4 sm:$0xff]   ;;  %v2479_v18 = vld [vmem:[%s3332_s11 + $0x328] ss:$16 sps:$4 sm:$0xff]   ;;  %v2484_v19 = vld [vmem:[%s3332_s11 + $0x344] ss:$16 sps:$4 sm:$0xff]  }
 0x305   :  { %v971_v33 = vadd.f32 %v957_v22, %v946_v30  ;;  %vm974_vm5 = vcmp.gt.f32.partialorder %v970_v26, 0.0  ;;  %v978_v27 = vmul.f32 0.2, %v970_v26  ;;  %v2487_v20 = vld [vmem:[%s3332_s11 + $0x34c] ss:$16 sps:$4 sm:$0xff]  }
 0x306   :  { %v973_v34 = vadd.f32 %v965_v25, %v948_v32  ;;  %v2482_v21 = vld [vmem:[%s3332_s11 + $0x340] ss:$16 sps:$4 sm:$0xff]   ;;  %v2485_v22 = vld [vmem:[%s3332_s11 + $0x348] ss:$16 sps:$4 sm:$0xff]   ;;  %v2490_v23 = vld [vmem:[%s3332_s11 + $0x364] ss:$16 sps:$4 sm:$0xff]  }
 0x307   :  { %vm975_vm6 = vcmp.gt.f32.partialorder %v971_v33, 0.0  ;;  %v979_v35 = vmul.f32 0.2, %v971_v33  ;;  %v982_v38 = vsel %vm974_vm5, %v970_v26, %v978_v27  ;;  %v2493_v24 = vld [vmem:[%s3332_s11 + $0x36c] ss:$16 sps:$4 sm:$0xff]   ;;  %vm976_vm8 = vcmp.gt.f32.partialorder %v3117_v31, 0.0 }
 0x308   :  { %vm977_vm7 = vcmp.gt.f32.partialorder %v973_v34, 0.0  ;;  %v981_v28 = vmul.f32 0.2, %v973_v34  ;;  %v1115_v45 = vpack.c.bf16 %v982_v38, %v982_v38  ;;  %v2488_v25 = vld [vmem:[%s3332_s11 + $0x360] ss:$16 sps:$4 sm:$0xff]  }
 0x309   :  { %v983_v40 = vsel %vm975_vm6, %v971_v33, %v979_v35  ;;  %v2491_v26 = vld [vmem:[%s3332_s11 + $0x368] ss:$16 sps:$4 sm:$0xff]   ;;  %v2496_v30 = vld [vmem:[%s3332_s11 + $0x384] ss:$16 sps:$4 sm:$0xff]   ;;  %v2499_v32 = vld [vmem:[%s3332_s11 + $0x38c] ss:$16 sps:$4 sm:$0xff]  }
 0x30a   :  { %v1116_v41 = vpack.c.bf16 %v983_v40, %v983_v40  ;;  %v985_v43 = vsel %vm977_vm7, %v973_v34, %v981_v28  ;;  %v2494_v33 = vld [vmem:[%s3332_s11 + $0x380] ss:$16 sps:$4 sm:$0xff]   ;;  %v2497_v27 = vld [vmem:[%s3332_s11 + $0x388] ss:$16 sps:$4 sm:$0xff]   ;;  %v2502_v34 = vld [vmem:[%s3332_s11 + $0x3a4] ss:$16 sps:$4 sm:$0xff]  }
 0x30b   :  { %v1118_v49 = vpack.c.bf16 %v985_v43, %v985_v43  ;;  %v2505_v35 = vld [vmem:[%s3332_s11 + $0x3ac] ss:$16 sps:$4 sm:$0xff]   ;;  %v2500_v38 = vld [vmem:[%s3332_s11 + $0x3a0] ss:$16 sps:$4 sm:$0xff]   ;;  %v2503_v28 = vld [vmem:[%s3332_s11 + $0x3a8] ss:$16 sps:$4 sm:$0xff]  }
 0x30c   :  { %1812 = vmatprep.mubr.bf16.mxu0 %v1116_v41  ;;  %1894 = vmatprep.mubr.bf16.mxu1 %v1116_v41  ;;  %v2508_v40 = vld [vmem:[%s3332_s11 + $0x3c4] ss:$16 sps:$4 sm:$0xff]   ;;  %v2511_v41 = vld [vmem:[%s3332_s11 + $0x3cc] ss:$16 sps:$4 sm:$0xff]  }
 0x30d   :  { %1813 = vmatmul.mubr.bf16.vlgmr.msra.gmra.mrb[8].mxu0 %v1115_v45  ;;  %1895 = vmatmul.mubr.bf16.vlgmr.msra.gmra.mrb[8].mxu1 %v1115_v45  ;;  %v2514_v43 = vld [vmem:[%s3332_s11 + $0x3e4] ss:$16 sps:$4 sm:$0xff]   ;;  %v2517_v45 = vld [vmem:[%s3332_s11 + $0x3ec] ss:$16 sps:$4 sm:$0xff]  }
 0x30e   :  { %1822 = vmatpush1.bf16.msra.mxu0 %v2422_v29  ;;  %1904 = vmatpush1.bf16.msra.mxu1 %v2425_v42  ;;  %v2506_v29 = vld [vmem:[%s3332_s11 + $0x3c0] ss:$16 sps:$4 sm:$0xff]   ;;  %v2509_v42 = vld [vmem:[%s3332_s11 + $0x3c8] ss:$16 sps:$4 sm:$0xff]  }
 0x30f   :  { %1853 = vmatprep.mubr.bf16.mxu0 %v1118_v49  ;;  %1935 = vmatprep.mubr.bf16.mxu1 %v1118_v49  ;;  %v2515_v49 = vld [vmem:[%s3332_s11 + $0x3e8] ss:$16 sps:$4 sm:$0xff]  }
 0x310   :  { %1823 = vmatprep.subr.bf16.mxu0 %v2430_v47  ;;  %1905 = vmatprep.subr.bf16.mxu1 %v2433_v48  ;;  %v980_v47 = vmul.f32 0.2, %v3117_v31  ;;  %v2512_v48 = vld [vmem:[%s3332_s11 + $0x3e0] ss:$16 sps:$4 sm:$0xff]  }
 0x312   :  { %1824 = vmatpush1.bf16.msra.mxu0 %v2428_v50  ;;  %1906 = vmatpush1.bf16.msra.mxu1 %v2431_v51  ;;  %v984_v50 = vsel %vm976_vm8, %v3117_v31, %v980_v47 }
 0x313   :  { %1825 = vmatprep.subr.bf16.mxu0 %v2436_v52  ;;  %1907 = vmatprep.subr.bf16.mxu1 %v2439_v53  ;;  %v1117_v51 = vpack.c.bf16 %v984_v50, %v984_v50  ;;  %v1114_v52 = vld [vmem:[%s3339_s12] sm:$0xf] }
 0x314   :  { %v1123_v53 = vrot.slane %v1114_v52, %v2878_v37 }
 0x316   :  { %1826 = vmatpush1.bf16.msra.mxu0 %v2434_v54  ;;  %1908 = vmatpush1.bf16.msra.mxu1 %v2437_v55  ;;  %v1131_v54 = vrot.slane %v1114_v52, %v3091_v44  ;;  %v1127_v55 = vrot.slane %v1114_v52, %v2884_v39 }
 0x317   :  { %1827 = vmatprep.subr.bf16.mxu0 %v2442_v56  ;;  %1909 = vmatprep.subr.bf16.mxu1 %v2445_v57  ;;  %v1135_v56 = vrot.slane %v1114_v52, %v3097_v46 }
 0x31a   :  { %1828 = vmatpush1.bf16.msra.mxu0 %v2440_v58  ;;  %1910 = vmatpush1.bf16.msra.mxu1 %v2443_v59 }
 0x31b   :  { %1829 = vmatprep.subr.bf16.mxu0 %v2448_v60  ;;  %1911 = vmatprep.subr.bf16.mxu1 %v2451_v36 }
 0x31e   :  { %1830 = vmatpush1.bf16.msra.mxu0 %v2446_v61  ;;  %1912 = vmatpush1.bf16.msra.mxu1 %v2449_v62 }
 0x31f   :  { %1831 = vmatprep.subr.bf16.mxu0 %v2454_v63  ;;  %1913 = vmatprep.subr.bf16.mxu1 %v2457_v0 }
 0x322   :  { %1832 = vmatpush1.bf16.msra.mxu0 %v2452_v1  ;;  %1914 = vmatpush1.bf16.msra.mxu1 %v2455_v2 }
 0x323   :  { %1833 = vmatprep.subr.bf16.mxu0 %v2460_v3  ;;  %1915 = vmatprep.subr.bf16.mxu1 %v2463_v4 }
 0x326   :  { %1834 = vmatpush1.bf16.msra.mxu0 %v2458_v5  ;;  %1916 = vmatpush1.bf16.msra.mxu1 %v2461_v6 }
 0x327   :  { %1835 = vmatprep.subr.bf16.mxu0 %v2466_v7  ;;  %1917 = vmatprep.subr.bf16.mxu1 %v2469_v8 }
 0x32a   :  { %1836 = vmatpush1.bf16.msra.mxu0 %v2464_v9  ;;  %1918 = vmatpush1.bf16.msra.mxu1 %v2467_v10 }
 0x32b   :  { %1837 = vmatprep.subr.bf16.mxu0 %v2472_v11  ;;  %1919 = vmatprep.subr.bf16.mxu1 %v2475_v12 }
 0x32e   :  { %1838 = vmatpush1.bf16.msra.mxu0 %v2470_v13  ;;  %1920 = vmatpush1.bf16.msra.mxu1 %v2473_v14 }
 0x32f   :  { %1839 = vmatprep.subr.bf16.mxu0 %v2478_v15  ;;  %1921 = vmatprep.subr.bf16.mxu1 %v2481_v16 }
 0x332   :  { %1840 = vmatpush1.bf16.msra.mxu0 %v2476_v17  ;;  %1922 = vmatpush1.bf16.msra.mxu1 %v2479_v18 }
 0x333   :  { %1841 = vmatprep.subr.bf16.mxu0 %v2484_v19  ;;  %1923 = vmatprep.subr.bf16.mxu1 %v2487_v20 }
 0x336   :  { %1842 = vmatpush1.bf16.msra.mxu0 %v2482_v21  ;;  %1924 = vmatpush1.bf16.msra.mxu1 %v2485_v22 }
 0x337   :  { %1843 = vmatprep.subr.bf16.mxu0 %v2490_v23  ;;  %1925 = vmatprep.subr.bf16.mxu1 %v2493_v24 }
 0x33a   :  { %1844 = vmatpush1.bf16.msra.mxu0 %v2488_v25  ;;  %1926 = vmatpush1.bf16.msra.mxu1 %v2491_v26 }
 0x33b   :  { %1845 = vmatprep.subr.bf16.mxu0 %v2496_v30  ;;  %1927 = vmatprep.subr.bf16.mxu1 %v2499_v32 }
 0x33e   :  { %1846 = vmatpush1.bf16.msra.mxu0 %v2494_v33  ;;  %1928 = vmatpush1.bf16.msra.mxu1 %v2497_v27 }
 0x33f   :  { %1847 = vmatprep.subr.bf16.mxu0 %v2502_v34  ;;  %1929 = vmatprep.subr.bf16.mxu1 %v2505_v35 }
 0x342   :  { %1848 = vmatpush1.bf16.msra.mxu0 %v2500_v38  ;;  %1930 = vmatpush1.bf16.msra.mxu1 %v2503_v28 }
 0x343   :  { %1849 = vmatprep.subr.bf16.mxu0 %v2508_v40  ;;  %1931 = vmatprep.subr.bf16.mxu1 %v2511_v41 }
 0x346   :  { %1850 = vmatpush1.bf16.msra.mxu0 %v2506_v29  ;;  %1932 = vmatpush1.bf16.msra.mxu1 %v2509_v42 }
 0x347   :  { %1851 = vmatprep.subr.bf16.mxu0 %v2514_v43  ;;  %1933 = vmatprep.subr.bf16.mxu1 %v2517_v45 }
 0x34a   :  { %1852 = vmatpush1.bf16.msra.mxu0 %v2512_v48  ;;  %1934 = vmatpush1.bf16.msra.mxu1 %v2515_v49 }
 0x34d   :  { %1854 = vmatmul.mubr.bf16.vlgmr.msra.gmra.mrb[8].mxu0 %v1117_v51  ;;  %1936 = vmatmul.mubr.bf16.vlgmr.msra.gmra.mrb[8].mxu1 %v1117_v51 }
 0x420   :  { %v1855_v57 = vpop.f32.mrb[8].mxu0  ;;  %v1937_v58 = vpop.f32.mrb[8].mxu1 }
 0x421   :  { %v2187_v31 = vadd.f32 %v1855_v57, %v1123_v53  ;;  %v2189_v59 = vadd.f32 %v1937_v58, %v1131_v54  ;;  %v1857_v60 = vpop.f32.mrb[9].mxu0  ;;  %v1939_v36 = vpop.f32.mrb[9].mxu1 }
 0x422   :  { %v2188_v61 = vadd.f32 %v1857_v60, %v1127_v55  ;;  %v2190_v62 = vadd.f32 %v1939_v36, %v1135_v56  ;;  %v1859_v63 = vpop.f32.mrb[10].mxu0  ;;  %v1941_v0 = vpop.f32.mrb[10].mxu1 }
 0x423   :  { %2530 = vtanh.f32 %v2187_v31  ;;  %v1860_v1 = vpop.f32.mrb[11].mxu0  ;;  %v1942_v2 = vpop.f32.mrb[11].mxu1 }
 0x424   :  { %2532 = vtanh.f32 %v2189_v59 }
 0x425   :  { %2534 = vtanh.f32 %v2188_v61 }
 0x426   :  { %2536 = vtanh.f32 %v2190_v62 }
 0x42d   :  { %v2531_v37 = vpop.eup %2530 }
 0x42e   :  { %v2533_v39 = vpop.eup %2532  ;;  %1948 = vst [vmem:[%s3340_s13] sm:$0xff] %v2531_v37 }
 0x42f   :  { %v2535_v44 = vpop.eup %2534  ;;  %1950 = vst [vmem:[%s3340_s13 + $0x10] sm:$0xff] %v2533_v39 }
 0x430   :  { %v2537_v46 = vpop.eup %2536  ;;  %1949 = vst [vmem:[%s3340_s13 + $0x8] sm:$0xff] %v2535_v44 }
 0x431   :  { %1951 = vst [vmem:[%s3340_s13 + $0x18] sm:$0xff] %v2537_v46 }

</bundles_post_ra>
